<compile_context>
chip_gen: v5e
topology: v5e:2x2
jax: 0.10.0
libtpu: 0.0.40
codegen_flags: <defaults>
</compile_context>

<pallas_src>
import jax
import jax.numpy as jnp
from jax import lax
from jax.experimental import pallas as pl
from jax.experimental.pallas import tpu as pltpu

POWER_ITERATIONS = 1
EPS = 1e-12


def spectral_norm_conv2d(x, w, b, u, v):
    """SpectralNorm(Conv2d(C, OC, 3, stride=1, padding=1)) forward.

    x: (N, C, H, W)      NCHW activations
    w: (OC, C, KH, KW)   weight_bar
    b: (OC,)             conv bias
    u: (OC,)             weight_u
    v: (C*KH*KW,)        weight_v
    returns: (N, OC, H, W)
    """
    N, C, H, W = x.shape
    OC, _, KH, KW = w.shape
    K = C * KH * KW
    S = H * W
    halo = (KH // 2) * W + (KW // 2)          # = W + 1 for 3x3 / pad 1
    S_halo = S + 2 * halo

    # ---- wrapper-side prep (one cheap pass over x, ~9% extra bytes) ----
    # flatten spatial into the lane axis and add a zero halo; the halo absorbs
    # the h-direction out-of-bounds taps of the 'same' convolution.
    x_halo = jnp.pad(x.reshape(N, C, S), ((0, 0), (0, 0), (halo, halo)))

    # permute weight columns (and v identically) from PyTorch's (c, kh, kw)
    # order to (kh, kw, c) so every tap owns a contiguous (OC, C) block.
    # sigma is invariant under the consistent permutation.
    w_mat = w.transpose(0, 2, 3, 1).reshape(OC, K)
    v_row = v.reshape(C, KH, KW).transpose(1, 2, 0).reshape(1, K)
    u_col = u.reshape(OC, 1)
    b_col = b.reshape(OC, 1)

    def kernel(x_ref, w_ref, u_ref, v_ref, b_ref, out_ref):
        # ---- power iteration + sigma + W/sigma ----
        # Recomputed per tile: the matrix is only (OC, K) = (8, 36), so this
        # is a handful of vreg ops and keeps the batch grid axis fully
        # independent ("parallel" / megacore-safe).
        wm = w_ref[...].astype(jnp.float32)               # (OC, K)
        uu = u_ref[...].astype(jnp.float32)               # (OC, 1)
        vv = v_ref[...].astype(jnp.float32)               # (1, K)
        for _ in range(POWER_ITERATIONS):
            # W^T u -> (1, K)   (VPU multiply + sublane reduce, no MXU)
            v_un = jnp.sum(wm * uu, axis=0, keepdims=True)
            v_nrm = jnp.sqrt(jnp.sum(v_un * v_un, axis=1, keepdims=True)) + EPS
            vv = v_un * pl.reciprocal(v_nrm, approx=False)
            # W v   -> (OC, 1)  (VPU multiply + lane reduce)
            u_un = jnp.sum(wm * vv, axis=1, keepdims=True)
            u_nrm = jnp.sqrt(jnp.sum(u_un * u_un, axis=0, keepdims=True)) + EPS
            uu = u_un * pl.reciprocal(u_nrm, approx=False)
        wv = jnp.sum(wm * vv, axis=1, keepdims=True)               # (OC, 1)
        sigma = jnp.sum(uu * wv, axis=0, keepdims=True)            # (1, 1)
        wn = wm * pl.reciprocal(sigma, approx=False)               # W_bar/sigma

        # ---- conv: 9 shifted-tap matmuls over the lane-flattened spatial ----
        xv = x_ref[0].astype(jnp.float32)                 # (C, S_halo)
        bias = b_ref[...].astype(jnp.float32)             # (OC, 1)

        # W-border masks, hoisted out of the tap loop (only dw != 0 needs one).
        col = lax.broadcasted_iota(jnp.int32, (C, S), 1) % W
        dws = sorted({kw - KW // 2 for kw in range(KW)})
        masks = {dw: ((col + dw >= 0) & (col + dw < W))
                 for dw in dws if dw != 0}

        # bias folded into the accumulator init (saves a trailing add).
        acc = jnp.broadcast_to(bias, (OC, S)).astype(jnp.float32)
        for kh in range(KH):
            for kw in range(KW):
                t = kh * KW + kw
                off = kh * W + kw            # = halo + (kh-1)*W + (kw-1)
                xs = xv[:, off:off + S]      # tap window, (C, S)
                dw = kw - KW // 2
                if dw != 0:                  # mask W-border row wrap-around
                    xs = jnp.where(masks[dw], xs, 0.0)
                acc = acc + lax.dot_general(
                    wn[:, t * C:(t + 1) * C], xs,
                    (((1,), (0,)), ((), ())),
                    preferred_element_type=jnp.float32)
        out_ref[0] = acc.astype(out_ref.dtype)

    out_flat = pl.pallas_call(
        kernel,
        out_shape=jax.ShapeDtypeStruct((N, OC, S), x.dtype),
        grid_spec=pltpu.PrefetchScalarGridSpec(
            num_scalar_prefetch=0,
            grid=(N,),
            in_specs=[
                pl.BlockSpec((1, C, S_halo), lambda i: (i, 0, 0)),
                pl.BlockSpec((OC, K), lambda i: (0, 0)),
                pl.BlockSpec((OC, 1), lambda i: (0, 0)),
                pl.BlockSpec((1, K), lambda i: (0, 0)),
                pl.BlockSpec((OC, 1), lambda i: (0, 0)),
            ],
            out_specs=pl.BlockSpec((1, OC, S), lambda i: (i, 0, 0)),
        ),
        # Every grid step is now independent (w_norm recomputed per step), so
        # the batch axis can be sharded across TensorCores on v7x.
        compiler_params=pltpu.CompilerParams(
            dimension_semantics=("parallel",)),
    )(x_halo, w_mat, u_col, v_row, b_col)

    # (N, OC, H*W) is already NCHW-contiguous -> reshape is free.
    return out_flat.reshape(N, OC, H, W)


def _l2normalize(v, eps=EPS):
    return v / (jnp.linalg.norm(v) + eps)


def _reference(x, w, b, u, v):
    """Pure-JAX reference mirroring SpectralNorm(Conv2d).forward."""
    OC = w.shape[0]
    w_mat = w.reshape(OC, -1)
    v1 = _l2normalize(w_mat.T @ u)
    u1 = _l2normalize(w_mat @ v1)
    sigma = u1 @ (w_mat @ v1)
    w_n = w / sigma
    out = lax.conv_general_dilated(
        x, w_n, window_strides=(1, 1), padding="SAME",
        dimension_numbers=("NCHW", "OIHW", "NCHW"))
    return out + b.reshape(1, -1, 1, 1)


if __name__ == "__main__":
    key = jax.random.PRNGKey(0)
    k_x, k_w, k_b, k_u, k_v = jax.random.split(key, 5)

    N, C, H, W = 2, 4, 16, 16
    OC, KH, KW = 8, 3, 3

    x = jax.random.normal(k_x, (N, C, H, W), dtype=jnp.float32)
    # Conv2d-like deterministic init (synthetic; not a checkpoint load)
    fan_in = C * KH * KW
    bound = 1.0 / (fan_in ** 0.5)
    w_bar = jax.random.uniform(k_w, (OC, C, KH, KW), jnp.float32, -bound, bound)
    bias = jax.random.uniform(k_b, (OC,), jnp.float32, -bound, bound)
    # u, v buffers as in _make_params: normal(0,1) then l2-normalized
    u0 = _l2normalize(jax.random.normal(k_u, (OC,), jnp.float32))
    v0 = _l2normalize(jax.random.normal(k_v, (fan_in,), jnp.float32))

    out = spectral_norm_conv2d(x, w_bar, bias, u0, v0)
    out = jax.block_until_ready(out)

    ref = _reference(x, w_bar, bias, u0, v0)
    assert out.shape == (N, OC, H, W)
    err = jnp.max(jnp.abs(out - ref))
    assert jnp.allclose(out, ref, rtol=1e-4, atol=1e-4), f"max abs err {err}"

    print("KERNEL_OK")
</pallas_src>

<mosaic_0001>
module attributes {stable_mosaic.version = 11 : i64} {
  func.func @kernel(%arg0: i32, %arg1: memref<1x4x290xf32, #tpu.memory_space<vmem>>, %arg2: memref<8x36xf32, #tpu.memory_space<vmem>>, %arg3: memref<8x1xf32, #tpu.memory_space<vmem>>, %arg4: memref<1x36xf32, #tpu.memory_space<vmem>>, %arg5: memref<8x1xf32, #tpu.memory_space<vmem>>, %arg6: memref<1x8x256xf32, #tpu.memory_space<vmem>>) attributes {dimension_semantics = [#tpu.dimension_semantics<parallel>], iteration_bounds = array<i64: 2>, scalar_prefetch = 0 : i64, scratch_operands = 0 : i64, tpu.core_type = #tpu.core_type<tc>, window_params = [{transform_indices = @transform_0, window_bounds = array<i64: 1, 4, 290>}, {pipeline_mode = #tpu.pipeline_mode<synchronous>, transform_indices = @transform_1, window_bounds = array<i64: 8, 36>}, {pipeline_mode = #tpu.pipeline_mode<synchronous>, transform_indices = @transform_2, window_bounds = array<i64: 8, 1>}, {pipeline_mode = #tpu.pipeline_mode<synchronous>, transform_indices = @transform_3, window_bounds = array<i64: 1, 36>}, {pipeline_mode = #tpu.pipeline_mode<synchronous>, transform_indices = @transform_4, window_bounds = array<i64: 8, 1>}, {transform_indices = @transform_5, window_bounds = array<i64: 1, 8, 256>}]} {
    %c0 = arith.constant 0 : index
    %c0_0 = arith.constant 0 : index
    %0 = vector.load %arg2[%c0, %c0_0] : memref<8x36xf32, #tpu.memory_space<vmem>>, vector<8x36xf32>
    %c0_1 = arith.constant 0 : index
    %c0_2 = arith.constant 0 : index
    %1 = vector.load %arg3[%c0_1, %c0_2] : memref<8x1xf32, #tpu.memory_space<vmem>>, vector<8x1xf32>
    %2 = vector.broadcast %1 : vector<8x1xf32> to vector<8x36xf32>
    %3 = arith.mulf %0, %2 : vector<8x36xf32>
    %cst = arith.constant dense<0.000000e+00> : vector<36xf32>
    %4 = vector.multi_reduction <add>, %3, %cst [0] : vector<8x36xf32> to vector<36xf32>
    %5 = vector.shape_cast %4 : vector<36xf32> to vector<1x36xf32>
    %6 = arith.mulf %5, %5 : vector<1x36xf32>
    %cst_3 = arith.constant dense<0.000000e+00> : vector<1xf32>
    %7 = vector.multi_reduction <add>, %6, %cst_3 [1] : vector<1x36xf32> to vector<1xf32>
    %8 = vector.shape_cast %7 : vector<1xf32> to vector<1x1xf32>
    %9 = math.sqrt %8 : vector<1x1xf32>
    %cst_4 = arith.constant 9.99999996E-13 : f32
    %10 = vector.broadcast %cst_4 : f32 to vector<1x1xf32>
    %11 = arith.addf %9, %10 : vector<1x1xf32>
    %12 = tpu.reciprocal %11 : vector<1x1xf32> -> vector<1x1xf32>
    %13 = vector.broadcast %12 : vector<1x1xf32> to vector<1x36xf32>
    %14 = arith.mulf %5, %13 : vector<1x36xf32>
    %15 = vector.broadcast %14 : vector<1x36xf32> to vector<8x36xf32>
    %16 = arith.mulf %0, %15 : vector<8x36xf32>
    %cst_5 = arith.constant dense<0.000000e+00> : vector<8xf32>
    %17 = vector.multi_reduction <add>, %16, %cst_5 [1] : vector<8x36xf32> to vector<8xf32>
    %18 = vector.shape_cast %17 : vector<8xf32> to vector<8x1xf32>
    %19 = arith.mulf %18, %18 : vector<8x1xf32>
    %cst_6 = arith.constant dense<0.000000e+00> : vector<1xf32>
    %20 = vector.multi_reduction <add>, %19, %cst_6 [0] : vector<8x1xf32> to vector<1xf32>
    %21 = vector.shape_cast %20 : vector<1xf32> to vector<1x1xf32>
    %22 = math.sqrt %21 : vector<1x1xf32>
    %cst_7 = arith.constant 9.99999996E-13 : f32
    %23 = vector.broadcast %cst_7 : f32 to vector<1x1xf32>
    %24 = arith.addf %22, %23 : vector<1x1xf32>
    %25 = tpu.reciprocal %24 : vector<1x1xf32> -> vector<1x1xf32>
    %26 = vector.broadcast %25 : vector<1x1xf32> to vector<8x1xf32>
    %27 = arith.mulf %18, %26 : vector<8x1xf32>
    %28 = vector.broadcast %14 : vector<1x36xf32> to vector<8x36xf32>
    %29 = arith.mulf %0, %28 : vector<8x36xf32>
    %cst_8 = arith.constant dense<0.000000e+00> : vector<8xf32>
    %30 = vector.multi_reduction <add>, %29, %cst_8 [1] : vector<8x36xf32> to vector<8xf32>
    %31 = vector.shape_cast %30 : vector<8xf32> to vector<8x1xf32>
    %32 = arith.mulf %27, %31 : vector<8x1xf32>
    %cst_9 = arith.constant dense<0.000000e+00> : vector<1xf32>
    %33 = vector.multi_reduction <add>, %32, %cst_9 [0] : vector<8x1xf32> to vector<1xf32>
    %34 = vector.shape_cast %33 : vector<1xf32> to vector<1x1xf32>
    %35 = tpu.reciprocal %34 : vector<1x1xf32> -> vector<1x1xf32>
    %36 = vector.broadcast %35 : vector<1x1xf32> to vector<8x36xf32>
    %37 = arith.mulf %0, %36 : vector<8x36xf32>
    %c0_10 = arith.constant 0 : index
    %c0_11 = arith.constant 0 : index
    %c0_12 = arith.constant 0 : index
    %38 = vector.load %arg1[%c0_10, %c0_11, %c0_12] : memref<1x4x290xf32, #tpu.memory_space<vmem>>, vector<1x4x290xf32>
    %39 = vector.shape_cast %38 : vector<1x4x290xf32> to vector<4x290xf32>
    %c0_13 = arith.constant 0 : index
    %c0_14 = arith.constant 0 : index
    %40 = vector.load %arg5[%c0_13, %c0_14] : memref<8x1xf32, #tpu.memory_space<vmem>>, vector<8x1xf32>
    %41 = tpu.iota {dimensions = array<i32: 1>} : vector<4x256xi32>
    %c16_i32 = arith.constant 16 : i32
    %c0_i32 = arith.constant 0 : i32
    %42 = arith.cmpi eq, %c16_i32, %c0_i32 : i32
    %c1_i32 = arith.constant 1 : i32
    %43 = arith.select %42, %c1_i32, %c16_i32 : i32
    %44 = vector.broadcast %43 : i32 to vector<4x256xi32>
    %45 = arith.remsi %41, %44 : vector<4x256xi32>
    %c0_i32_15 = arith.constant 0 : i32
    %46 = vector.broadcast %c0_i32_15 : i32 to vector<4x256xi32>
    %47 = arith.cmpi ne, %45, %46 : vector<4x256xi32>
    %c0_i32_16 = arith.constant 0 : i32
    %48 = vector.broadcast %c0_i32_16 : i32 to vector<4x256xi32>
    %49 = arith.cmpi slt, %45, %48 : vector<4x256xi32>
    %c0_i32_17 = arith.constant 0 : i32
    %50 = arith.cmpi slt, %43, %c0_i32_17 : i32
    %51 = vector.broadcast %50 : i1 to vector<4x256xi1>
    %52 = vector.broadcast %51 : vector<4x256xi1> to vector<4x256xi1>
    %53 = arith.xori %49, %52 : vector<4x256xi1>
    %54 = arith.andi %53, %47 : vector<4x256xi1>
    %55 = vector.broadcast %43 : i32 to vector<4x256xi32>
    %56 = arith.addi %45, %55 : vector<4x256xi32>
    %57 = arith.select %54, %56, %45 : vector<4x256xi1>, vector<4x256xi32>
    %c-1_i32 = arith.constant -1 : i32
    %58 = vector.broadcast %c-1_i32 : i32 to vector<4x256xi32>
    %59 = arith.addi %57, %58 : vector<4x256xi32>
    %c0_i32_18 = arith.constant 0 : i32
    %60 = vector.broadcast %c0_i32_18 : i32 to vector<4x256xi32>
    %61 = arith.cmpi sge, %59, %60 : vector<4x256xi32>
    %c-1_i32_19 = arith.constant -1 : i32
    %62 = vector.broadcast %c-1_i32_19 : i32 to vector<4x256xi32>
    %63 = arith.addi %57, %62 : vector<4x256xi32>
    %c16_i32_20 = arith.constant 16 : i32
    %64 = vector.broadcast %c16_i32_20 : i32 to vector<4x256xi32>
    %65 = arith.cmpi slt, %63, %64 : vector<4x256xi32>
    %66 = arith.andi %61, %65 : vector<4x256xi1>
    %c1_i32_21 = arith.constant 1 : i32
    %67 = vector.broadcast %c1_i32_21 : i32 to vector<4x256xi32>
    %68 = arith.addi %57, %67 : vector<4x256xi32>
    %c0_i32_22 = arith.constant 0 : i32
    %69 = vector.broadcast %c0_i32_22 : i32 to vector<4x256xi32>
    %70 = arith.cmpi sge, %68, %69 : vector<4x256xi32>
    %c1_i32_23 = arith.constant 1 : i32
    %71 = vector.broadcast %c1_i32_23 : i32 to vector<4x256xi32>
    %72 = arith.addi %57, %71 : vector<4x256xi32>
    %c16_i32_24 = arith.constant 16 : i32
    %73 = vector.broadcast %c16_i32_24 : i32 to vector<4x256xi32>
    %74 = arith.cmpi slt, %72, %73 : vector<4x256xi32>
    %75 = arith.andi %70, %74 : vector<4x256xi1>
    %76 = vector.shape_cast %40 : vector<8x1xf32> to vector<8x1xf32>
    %77 = vector.broadcast %76 : vector<8x1xf32> to vector<8x256xf32>
    %78 = vector.extract_strided_slice %39 {offsets = [0, 0], sizes = [4, 256], strides = [1, 1]} : vector<4x290xf32> to vector<4x256xf32>
    %cst_25 = arith.constant 0.000000e+00 : f32
    %79 = vector.broadcast %cst_25 : f32 to vector<4x256xf32>
    %80 = arith.select %66, %78, %79 : vector<4x256xi1>, vector<4x256xf32>
    %81 = vector.extract_strided_slice %37 {offsets = [0, 0], sizes = [8, 4], strides = [1, 1]} : vector<8x36xf32> to vector<8x4xf32>
    %cst_26 = arith.constant dense<0.000000e+00> : vector<8x256xf32>
    %82 = tpu.matmul %81, %80, %cst_26 {dimension_numbers = #tpu.dot_dimension_numbers<[1], [0], [0], [1], [0, 0, 1, 1], [], []>} : vector<8x4xf32>, vector<4x256xf32>, vector<8x256xf32> -> vector<8x256xf32>
    %83 = arith.addf %77, %82 : vector<8x256xf32>
    %84 = vector.extract_strided_slice %39 {offsets = [0, 1], sizes = [4, 256], strides = [1, 1]} : vector<4x290xf32> to vector<4x256xf32>
    %85 = vector.extract_strided_slice %37 {offsets = [0, 4], sizes = [8, 4], strides = [1, 1]} : vector<8x36xf32> to vector<8x4xf32>
    %cst_27 = arith.constant dense<0.000000e+00> : vector<8x256xf32>
    %86 = tpu.matmul %85, %84, %cst_27 {dimension_numbers = #tpu.dot_dimension_numbers<[1], [0], [0], [1], [0, 0, 1, 1], [], []>} : vector<8x4xf32>, vector<4x256xf32>, vector<8x256xf32> -> vector<8x256xf32>
    %87 = arith.addf %83, %86 : vector<8x256xf32>
    %88 = vector.extract_strided_slice %39 {offsets = [0, 2], sizes = [4, 256], strides = [1, 1]} : vector<4x290xf32> to vector<4x256xf32>
    %cst_28 = arith.constant 0.000000e+00 : f32
    %89 = vector.broadcast %cst_28 : f32 to vector<4x256xf32>
    %90 = arith.select %75, %88, %89 : vector<4x256xi1>, vector<4x256xf32>
    %91 = vector.extract_strided_slice %37 {offsets = [0, 8], sizes = [8, 4], strides = [1, 1]} : vector<8x36xf32> to vector<8x4xf32>
    %cst_29 = arith.constant dense<0.000000e+00> : vector<8x256xf32>
    %92 = tpu.matmul %91, %90, %cst_29 {dimension_numbers = #tpu.dot_dimension_numbers<[1], [0], [0], [1], [0, 0, 1, 1], [], []>} : vector<8x4xf32>, vector<4x256xf32>, vector<8x256xf32> -> vector<8x256xf32>
    %93 = arith.addf %87, %92 : vector<8x256xf32>
    %94 = vector.extract_strided_slice %39 {offsets = [0, 16], sizes = [4, 256], strides = [1, 1]} : vector<4x290xf32> to vector<4x256xf32>
    %cst_30 = arith.constant 0.000000e+00 : f32
    %95 = vector.broadcast %cst_30 : f32 to vector<4x256xf32>
    %96 = arith.select %66, %94, %95 : vector<4x256xi1>, vector<4x256xf32>
    %97 = vector.extract_strided_slice %37 {offsets = [0, 12], sizes = [8, 4], strides = [1, 1]} : vector<8x36xf32> to vector<8x4xf32>
    %cst_31 = arith.constant dense<0.000000e+00> : vector<8x256xf32>
    %98 = tpu.matmul %97, %96, %cst_31 {dimension_numbers = #tpu.dot_dimension_numbers<[1], [0], [0], [1], [0, 0, 1, 1], [], []>} : vector<8x4xf32>, vector<4x256xf32>, vector<8x256xf32> -> vector<8x256xf32>
    %99 = arith.addf %93, %98 : vector<8x256xf32>
    %100 = vector.extract_strided_slice %39 {offsets = [0, 17], sizes = [4, 256], strides = [1, 1]} : vector<4x290xf32> to vector<4x256xf32>
    %101 = vector.extract_strided_slice %37 {offsets = [0, 16], sizes = [8, 4], strides = [1, 1]} : vector<8x36xf32> to vector<8x4xf32>
    %cst_32 = arith.constant dense<0.000000e+00> : vector<8x256xf32>
    %102 = tpu.matmul %101, %100, %cst_32 {dimension_numbers = #tpu.dot_dimension_numbers<[1], [0], [0], [1], [0, 0, 1, 1], [], []>} : vector<8x4xf32>, vector<4x256xf32>, vector<8x256xf32> -> vector<8x256xf32>
    %103 = arith.addf %99, %102 : vector<8x256xf32>
    %104 = vector.extract_strided_slice %39 {offsets = [0, 18], sizes = [4, 256], strides = [1, 1]} : vector<4x290xf32> to vector<4x256xf32>
    %cst_33 = arith.constant 0.000000e+00 : f32
    %105 = vector.broadcast %cst_33 : f32 to vector<4x256xf32>
    %106 = arith.select %75, %104, %105 : vector<4x256xi1>, vector<4x256xf32>
    %107 = vector.extract_strided_slice %37 {offsets = [0, 20], sizes = [8, 4], strides = [1, 1]} : vector<8x36xf32> to vector<8x4xf32>
    %cst_34 = arith.constant dense<0.000000e+00> : vector<8x256xf32>
    %108 = tpu.matmul %107, %106, %cst_34 {dimension_numbers = #tpu.dot_dimension_numbers<[1], [0], [0], [1], [0, 0, 1, 1], [], []>} : vector<8x4xf32>, vector<4x256xf32>, vector<8x256xf32> -> vector<8x256xf32>
    %109 = arith.addf %103, %108 : vector<8x256xf32>
    %110 = vector.extract_strided_slice %39 {offsets = [0, 32], sizes = [4, 256], strides = [1, 1]} : vector<4x290xf32> to vector<4x256xf32>
    %cst_35 = arith.constant 0.000000e+00 : f32
    %111 = vector.broadcast %cst_35 : f32 to vector<4x256xf32>
    %112 = arith.select %66, %110, %111 : vector<4x256xi1>, vector<4x256xf32>
    %113 = vector.extract_strided_slice %37 {offsets = [0, 24], sizes = [8, 4], strides = [1, 1]} : vector<8x36xf32> to vector<8x4xf32>
    %cst_36 = arith.constant dense<0.000000e+00> : vector<8x256xf32>
    %114 = tpu.matmul %113, %112, %cst_36 {dimension_numbers = #tpu.dot_dimension_numbers<[1], [0], [0], [1], [0, 0, 1, 1], [], []>} : vector<8x4xf32>, vector<4x256xf32>, vector<8x256xf32> -> vector<8x256xf32>
    %115 = arith.addf %109, %114 : vector<8x256xf32>
    %116 = vector.extract_strided_slice %39 {offsets = [0, 33], sizes = [4, 256], strides = [1, 1]} : vector<4x290xf32> to vector<4x256xf32>
    %117 = vector.extract_strided_slice %37 {offsets = [0, 28], sizes = [8, 4], strides = [1, 1]} : vector<8x36xf32> to vector<8x4xf32>
    %cst_37 = arith.constant dense<0.000000e+00> : vector<8x256xf32>
    %118 = tpu.matmul %117, %116, %cst_37 {dimension_numbers = #tpu.dot_dimension_numbers<[1], [0], [0], [1], [0, 0, 1, 1], [], []>} : vector<8x4xf32>, vector<4x256xf32>, vector<8x256xf32> -> vector<8x256xf32>
    %119 = arith.addf %115, %118 : vector<8x256xf32>
    %120 = vector.extract_strided_slice %39 {offsets = [0, 34], sizes = [4, 256], strides = [1, 1]} : vector<4x290xf32> to vector<4x256xf32>
    %cst_38 = arith.constant 0.000000e+00 : f32
    %121 = vector.broadcast %cst_38 : f32 to vector<4x256xf32>
    %122 = arith.select %75, %120, %121 : vector<4x256xi1>, vector<4x256xf32>
    %123 = vector.extract_strided_slice %37 {offsets = [0, 32], sizes = [8, 4], strides = [1, 1]} : vector<8x36xf32> to vector<8x4xf32>
    %cst_39 = arith.constant dense<0.000000e+00> : vector<8x256xf32>
    %124 = tpu.matmul %123, %122, %cst_39 {dimension_numbers = #tpu.dot_dimension_numbers<[1], [0], [0], [1], [0, 0, 1, 1], [], []>} : vector<8x4xf32>, vector<4x256xf32>, vector<8x256xf32> -> vector<8x256xf32>
    %125 = arith.addf %119, %124 : vector<8x256xf32>
    %c0_40 = arith.constant 0 : index
    %c0_41 = arith.constant 0 : index
    %c0_42 = arith.constant 0 : index
    %126 = vector.load %arg6[%c0_40, %c0_41, %c0_42] : memref<1x8x256xf32, #tpu.memory_space<vmem>>, vector<1x8x256xf32>
    %127 = vector.shape_cast %126 : vector<1x8x256xf32> to vector<8x256xf32>
    %128 = vector.shape_cast %125 : vector<8x256xf32> to vector<1x8x256xf32>
    tpu.vector_store %arg6[%c0_40, %c0_41, %c0_42], %128 {strides = array<i32>} : memref<1x8x256xf32, #tpu.memory_space<vmem>>, vector<1x8x256xf32>,
    return
  }
  func.func @transform_0(%arg0: i32) -> (i32, i32, i32) {
    %c0_i32 = arith.constant 0 : i32
    %c0_i32_0 = arith.constant 0 : i32
    %c0_i32_1 = arith.constant 0 : i32
    return %arg0, %c0_i32, %c0_i32_0 : i32, i32, i32
  }
  func.func @transform_1(%arg0: i32) -> (i32, i32) {
    %c0_i32 = arith.constant 0 : i32
    %c0_i32_0 = arith.constant 0 : i32
    %c0_i32_1 = arith.constant 0 : i32
    return %c0_i32, %c0_i32_0 : i32, i32
  }
  func.func @transform_2(%arg0: i32) -> (i32, i32) {
    %c0_i32 = arith.constant 0 : i32
    %c0_i32_0 = arith.constant 0 : i32
    %c0_i32_1 = arith.constant 0 : i32
    return %c0_i32, %c0_i32_0 : i32, i32
  }
  func.func @transform_3(%arg0: i32) -> (i32, i32) {
    %c0_i32 = arith.constant 0 : i32
    %c0_i32_0 = arith.constant 0 : i32
    %c0_i32_1 = arith.constant 0 : i32
    return %c0_i32, %c0_i32_0 : i32, i32
  }
  func.func @transform_4(%arg0: i32) -> (i32, i32) {
    %c0_i32 = arith.constant 0 : i32
    %c0_i32_0 = arith.constant 0 : i32
    %c0_i32_1 = arith.constant 0 : i32
    return %c0_i32, %c0_i32_0 : i32, i32
  }
  func.func @transform_5(%arg0: i32) -> (i32, i32, i32) {
    %c0_i32 = arith.constant 0 : i32
    %c0_i32_0 = arith.constant 0 : i32
    %c0_i32_1 = arith.constant 0 : i32
    return %arg0, %c0_i32, %c0_i32_0 : i32, i32, i32
  }
}

</mosaic_0001>

<bundles_post_ra>
// kernel: tpu_custom_call.1
= control target key start
LH: loop header
LB: loop body
LE: loop exit
PB: predicated region body
PF: predicated region fallthrough
CT: control target
= control target key end

     0   :  { %10 = vsyncpa [#allocation3], 0  ;;  %s1652_s0 = inlined_call_operand.hbm [shape: f32[2,4,290], index: 0, kind: input, shape index: {}]   ;;  %s1653_s1 = inlined_call_operand.vmem [shape: f32[8,36], index: 1, kind: input, shape index: {}]   ;;  %s1654_s2 = inlined_call_operand.vmem [shape: f32[8,1], index: 2, kind: input, shape index: {}]   ;;  %s1655_s3 = inlined_call_operand.vmem [shape: f32[1,36], index: 3, kind: input, shape index: {}]   ;;  %s1656_s4 = inlined_call_operand.vmem [shape: f32[8,1], index: 4, kind: input, shape index: {}]   ;;  %s1657_s5 = inlined_call_operand.hbm [shape: f32[2,8,256], index: 5, kind: output, shape index: {}]  }
   0x1   :  { %12 = vsyncpa [#allocation3 + $0x1], 0 }
   0x2   :  { %13 = vsyncpa [#allocation4], 0 }
   0x3   :  { %15 = vsyncpa [#allocation4 + $0x1], 0  ;;  %s1371_s18 = smov 0   ;;  %s1373_s19 = smov 0  }
   0x4   :  { %s1375_s20 = smov 0   ;;  %s1377_s21 = smov 0  }
   0x5 LB: > { %s1392_s3 = sadd.s32 4294967295, %s1324_s21   ;;  %s1104_s22 = sadd.s32 4294967294, %s1324_s21   ;;  %s1324_s21 = sphi %s1377_s21, %s1665_s21   ;;  %s1320_s20 = sphi %s1375_s20, %s1664_s20   ;;  %s1316_s19 = sphi %s1373_s19, %s1663_s19   ;;  %s1312_s18 = sphi %s1371_s18, %s1662_s18  }
   0x6   : > { %s1396_s23 = sadd.s32 1, %s1324_s21   ;;  %s28_s24 = sadd.s32 1, %s1320_s20 }
   0x7   : > { %s25_s25 = ssub.s32 %s1324_s21, %s1396_s23  ;;  %p35_p0 = scmp.ne.s32.totalorder %s1320_s20, %s1316_s19 }
   0x8   : > { %p26_p1 = scmp.eq.s32.totalorder %s25_s25, 0  ;;  %p36_p2 = scmp.eq.s32.totalorder %s1324_s21, 0 }
   0x9   : > { %p41_p3 = scmp.ne.s32.totalorder %s1316_s19, %s1312_s18  ;;  %p42_p4 = scmp.eq.s32.totalorder %s1392_s3, 0 }
   0xa   : > { %s1408_s26 = scalar_select %p26_p1, %s1320_s20, %s28_s24  }
   0xb   : > { %p37_p5 = por %p36_p2, %p35_p0  ;;  %p1410_p6 = por %p42_p4, %p41_p3 }
   0xc   : > { %p149_p7 = scmp.eq.s32.totalorder %s1392_s3, 1  ;;  %p155_p8 = scmp.eq.s32.totalorder %s1104_s22, 1 }
   0xd   : > { %p1106_p9 = scmp.ge.s32.totalorder %s1324_s21, 2  ;;  %p1167_p10 = scmp.lt.s32.totalorder %s1324_s21, 2 }
   0xe   : > { %p1417_p11 = por %p149_p7, %p35_p0  ;;  %p1421_p12 = por %p155_p8, %p41_p3 }
   0xf   : > { %s187_s30 = sand.u32 1, %s1320_s20   ;;  %s1153_s6 = smul.u32 12, %s1324_s21 }
  0x10   : > { %s1152_s7 = smul.u32 12, %s187_s30  ;;  %p1430_p13 = pnand %p1167_p10, %p37_p5 }
  0x11   : > { %s196_s10 = scalar_lea.hbm %s1652_s0, %s1153_s6  ;;  %s188_s15 = scalar_lea.sflag [#allocation3], %s187_s30 }
  0x12   : > { %s198_s12 = sshll.u32 %s196_s10, 4  ;;  %s191_s13 = scalar_lea.vmem [#allocation2], %s1152_s7  ;;  %s199_s12 = int_to_ptr.hbm [resolvable:$true] %s198_s12 }
  0x13   : > { %s200_s14 = sshll.u32 %s191_s13, 4  ;;  %s1228_s16 = sshra.s32 %s199_s12, 4  ;;  %s201_s14 = int_to_ptr.vmem [resolvable:$true] %s200_s14  ;;  %s1229_s16 = int_to_ptr.hbm [resolvable:$true] %s1228_s16 }
  0x14   : > { %s1230_s17 = scalar_lea.hbm %s1229_s16, 12  ;;  %p1232_p1 = pneg %p1430_p13 }
  0x15   : > { %p1231_p0 = scmp.ne.s32.totalorder %s1229_s16, %s1230_s17  ;;  %s1235_s25 = scalar_lea.hbm %s1652_s0, 24 }
  0x16   : > { %p1236_p4 = scmp.lt.s32.totalorder %s1229_s16, %s1652_s0  ;;  %p1237_p5 = scmp.lt.s32.totalorder %s1235_s25, %s1230_s17 }
  0x17   : > { %p1233_p2 = pnand %p1232_p1, %p1231_p0 }
  0x18   : > { %p1238_p7 = por %p1237_p5, %p1236_p4 }
  0x19   : > { %p1234_p3 = pneg %p1233_p2 }
  0x1b   : > { %p1239_p8 = pnand %p1238_p7, %p1234_p3 }
  0x1d   : > { %1242 = shalt.err (!%p1239_p8)
}
  0x1e   : > { %1162 = dma.hbm_to_vmem [thread:$0]  (!%p1430_p13), %s199_s12, 192, %s201_s14, %s188_s15  }
  0x1f   : > { %p1108_p10 = scmp.ge.s32.totalorder %s1324_s21, 1  ;;  %p205_p0 = scmp.lt.s32.totalorder %s1324_s21, 3 }
  0x21   : > { %p206_p1 = pnand %p1108_p10, %p205_p0 }
  0x22   : > { %s1447_s30 = sand.u32 (!%p206_p1), 1, %s1316_s19  }
  0x23   : > { %209 = sbr.rel (%p206_p1) target bundleno = 815 (0x32f), region = 40  ;;  %s212_s9 = scalar_lea.sflag (!%p206_p1), [#allocation3], %s1447_s30 }
  0x24   : > { %s1154_s7 = smul.u32 (!%p206_p1), 12, %s1447_s30 }
  0x26   : > { %s1451_s10 = scalar_lea.vmem (!%p206_p1), [#allocation2], %s1154_s7 }
  0x28   : > { %1303 = dma.done.wait (%p1410_p6), %s212_s9, 192  }
  0x29   : > { %1305 = vsyncadd (%p1410_p6), %s212_s9, 4294967104  ;;  %v1326_v0 = vmov 0   ;;  %v244_v1 = vld [vmem:[%s1654_s2] sm:$0xff]  ;;  %vm251_vm0 = vcmask 293888   ;;  %v1471_v39 = vld [vmem:[%s1451_s10] sm:$0xff]  ;;  %s1327_s27 = smov 127  }
  0x2a   : > { %1216 = vset.pattern.permute.xlu0 %v1326_v0  ;;  %1217 = vset.pattern.permute.xlu2 %v1326_v0  ;;  %v1463_v2 = vld [vmem:[%s1653_s1] sm:$0xff]  ;;  %404 = vst [vmem:[#allocation1] ss:$2 sm:$0xff] %v1471_v39  ;;  %v1480_v44 = vld [vmem:[%s1451_s10 + $0x8] sm:$0xf]  ;;  %s1328_s15 = smov 126  }
  0x2b   : > { %247 = vperm.xlu0 %1216, %v244_v1   ;;  %469 = vst [vmem:[#allocation1 + $0x10] ss:$2 sm:$0xff] %v1480_v44  ;;  %s1329_s16 = smov 112   ;;  %s1330_s17 = smov 111   ;;  %vm415_vm15 = vcmask 1043456  }
  0x2c   : > { %s1331_s22 = smov 110   ;;  %s1332_s24 = smov 96  }
  0x2d   : > { %s1333_s25 = smov 95   ;;  %s1334_s6 = smov 116  }
  0x2e   : > { %s1335_s8 = smov 120   ;;  %s1336_s7 = smov 124  }
  0x2f   : > { %s1337_s9 = smov 108   ;;  %s1338_s10 = smov 94  }
  0x30   : > { %s1339_s11 = smov 100   ;;  %s1340_s12 = smov 104  }
  0x31   : > { %v1474_v40 = vld.sshfl [vmem:[#allocation1] sm:$0xff pattern:$0x75316420]  ;;  %v1476_v41 = vld.sshfl [vmem:[#allocation1 + $0x8] sm:$0xff pattern:$0x75316420] }
  0x32   : > { %467 = vst [vmem:[#allocation1] ss:$2 sm:$0xff] %v1471_v39  ;;  %v472_v45 = vld.sshfl [vmem:[#allocation1 + $0x10] sm:$0xff pattern:$0x75316420] }
  0x33   : > { %532 = vst [vmem:[#allocation1 + $0x10] ss:$2 sm:$0xff] %v1480_v44 }
  0x39   : > { %v470_v42 = vld.sshfl [vmem:[#allocation1] sm:$0xff pattern:$0x75316420]  ;;  %v471_v43 = vld.sshfl [vmem:[#allocation1 + $0x8] sm:$0xff pattern:$0x75316420] }
  0x3a   : > { %475 = vrot.lane.b32.xlu2 %v471_v43, %s1327_s27  ;;  %530 = vst [vmem:[#allocation1] ss:$2 sm:$0xff] %v1471_v39  ;;  %v535_v50 = vld.sshfl [vmem:[#allocation1 + $0x10] sm:$0xff pattern:$0x75316420] }
  0x3b   : > { %603 = vst [vmem:[#allocation1 + $0x10] ss:$2 sm:$0xff] %v1480_v44 }
  0x41   : > { %v533_v48 = vld.sshfl [vmem:[#allocation1] sm:$0xff pattern:$0x75316420]  ;;  %v534_v49 = vld.sshfl [vmem:[#allocation1 + $0x8] sm:$0xff pattern:$0x75316420] }
  0x42   : > { %477 = vrot.lane.b32.xlu2 %v472_v45, %s1327_s27  ;;  %601 = vst [vmem:[#allocation1] ss:$2 sm:$0xff] %v1471_v39  ;;  %v606_v61 = vld.sshfl [vmem:[#allocation1 + $0x10] sm:$0xff pattern:$0x75316420] }
  0x43   : > { %676 = vst [vmem:[#allocation1 + $0x10] ss:$2 sm:$0xff] %v1480_v44 }
  0x49   : > { %v605_v55 = vld.sshfl [vmem:[#allocation1 + $0x8] sm:$0xff pattern:$0x75316420]  ;;  %v604_v56 = vld.sshfl [vmem:[#allocation1] sm:$0xff pattern:$0x75316420] }
  0x4a   : > { %536 = vrot.lane.b32.xlu2 %v533_v48, %s1328_s15  ;;  %674 = vst [vmem:[#allocation1] ss:$2 sm:$0xff] %v1471_v39 }
  0x51   : > { %v677_v59 = vld.sshfl [vmem:[#allocation1] sm:$0xff pattern:$0x75316420]  ;;  %v678_v60 = vld.sshfl [vmem:[#allocation1 + $0x8] sm:$0xff pattern:$0x75316420] }
  0x52   : > { %538 = vrot.lane.b32.xlu2 %v534_v49, %s1328_s15  ;;  %737 = vst [vmem:[#allocation1] ss:$2 sm:$0xff] %v1471_v39 }
  0x59   : > { %v741_v1 = vld.sshfl [vmem:[#allocation1 + $0x8] sm:$0xff pattern:$0x75316420] }
  0x5a   : > { %607 = vrot.lane.b32.xlu2 %v604_v56, %s1329_s16 }
  0x62   : > { %611 = vrot.lane.b32.xlu2 %v606_v61, %s1329_s16 }
  0x9d   : > { %v248_v3 = vpop.permute.xlu0 %247 }
  0x9e   : > { %v250_v4 = vmul.f32 %v248_v3, %v1463_v2 }
  0xa0   : > { %v252_v5 = vsel %vm251_vm0, %v250_v4, 0.0  ;;  %v679_v4 = vld.sshfl [vmem:[#allocation1 + $0x10] sm:$0xff pattern:$0x75316420] }
  0xa1   : > { %v253_v6 = vrot.slane %v252_v5, 4  ;;  %739 = vst [vmem:[#allocation1 + $0x10] ss:$2 sm:$0xff] %v1480_v44 }
  0xa3   : > { %v254_v7 = vadd.f32 %v253_v6, %v252_v5 }
  0xa5   : > { %v255_v8 = vrot.slane %v254_v7, 2 }
  0xa7   : > { %v256_v9 = vadd.f32 %v255_v8, %v254_v7 }
  0xa9   : > { %v257_v10 = vrot.slane %v256_v9, 1 }
  0xab   : > { %v258_v11 = vadd.f32 %v257_v10, %v256_v9  ;;  %v740_v9 = vld.sshfl [vmem:[#allocation1] sm:$0xff pattern:$0x75316420] }
  0xac   : > { %808 = vst [vmem:[#allocation1] ss:$2 sm:$0xff] %v1471_v39  ;;  %743 = vrot.lane.b32.xlu2 %v740_v9, %s1331_s22 }
  0xad   : > { %v259_v12 = vmul.f32 %v258_v11, %v258_v11 }
  0xaf   : > { %v260_v13 = vsel %vm251_vm0, %v259_v12, 0.0 }
  0xb0   : > { %261 = vadd.xlane.f32.xlu0 %v260_v13 }
  0xc4   : > { %682 = vrot.lane.b32.xlu0 %v678_v60, %s1330_s17 }
 0x123   : > { %v262_v14 = vpop.xlane.xlu0 %261 }
 0x124   : > { %1218 = vrsqrt.f32 %v262_v14  ;;  %vm270_vm1 = vcmp.eq.f32.partialorder %v262_v14, inf  ;;  %v273_v22 = vand.u32 2147483648, %v262_v14  ;;  %vm272_vm2 = vcmp.eq.f32.partialorder %v262_v14, 0.0 }
 0x12a   : > { %v1219_v15 = vpop.eup %1218 }
 0x12b   : > { %v264_v16 = vmul.f32 %v1219_v15, %v262_v14 }
 0x12d   : > { %v265_v17 = vmul.f32 %v1219_v15, %v264_v16 }
 0x12f   : > { %v266_v18 = vmul.f32 0.5, %v265_v17 }
 0x131   : > { %v267_v19 = vsub.f32 1.5, %v266_v18 }
 0x133   : > { %v268_v20 = vmul.f32 %v1219_v15, %v267_v19  ;;  %v812_v15 = vld.sshfl [vmem:[#allocation1 + $0x8] sm:$0xff pattern:$0x75316420]  ;;  %v355_v19 = vlaneseq }
 0x135   : > { %v269_v21 = vmul.f32 %v268_v20, %v262_v14 }
 0x137   : > { %v271_v23 = vsel %vm270_vm1, %v262_v14, %v269_v21  ;;  %v1502_v14 = vld.sshfl [vmem:[#allocation1] sm:$0xff pattern:$0x75316420]  ;;  %v1508_v21 = vand.u32 127, %v355_v19 }
 0x138   : > { %v274_v24 = vsel %vm272_vm2, %v273_v22, %v271_v23  ;;  %881 = vst [vmem:[#allocation1] ss:$2 sm:$0xff] %v1471_v39 }
 0x139   : > { %v275_v25 = vadd.f32 1e-12, %v274_v24 }
 0x13b   : > { %1220 = vrcp.f32 %v275_v25  ;;  %v287_v29 = vand.u32 2147483648, %v275_v25  ;;  %v285_v31 = vand.u32 2147483647, %v275_v25  ;;  %vm281_vm4 = vweird.f32 %v275_v25 }
 0x13d   : > { %v288_v33 = vor.u32 1.1754944e-38, %v287_v29  ;;  %vm286_vm6 = vcmp.eq.f32.partialorder %v285_v31, 8.507059e+37  ;;  %v362_v29 = vand.u32 15, %v1508_v21 }
 0x141   : > { %v1221_v26 = vpop.eup %1220 }
 0x142   : > { %v277_v27 = vmul.f32 %v1221_v26, %v275_v25  ;;  %vm282_vm3 = vweird.f32 %v1221_v26  ;;  %v885_v25 = vld.sshfl [vmem:[#allocation1 + $0x8] sm:$0xff pattern:$0x75316420] }
 0x143   : > { %vm283_vm5 = vmor %vm281_vm4, %vm282_vm3  ;;  %vm411_vm4 = vcmask 31744  }
 0x144   : > { %v278_v28 = vsub.f32 1.0, %v277_v27 }
 0x146   : > { %v279_v30 = vmul.f32 %v1221_v26, %v278_v28 }
 0x148   : > { %v280_v32 = vadd.f32 %v1221_v26, %v279_v30 }
 0x14a   : > { %v284_v34 = vsel %vm283_vm5, %v1221_v26, %v280_v32  ;;  %v1511_v26 = vadd.s32 128, %v1508_v21  ;;  %vm479_vm5 = vcmask 1039360  }
 0x14b   : > { %v289_v35 = vsel %vm286_vm6, %v288_v33, %v284_v34  ;;  %v1521_v33 = vadd.s32 4294967295, %v362_v29  ;;  %vm542_vm6 = vcmask 1031168  }
 0x14c   : > { %v290_v36 = vmul.f32 %v289_v35, %v258_v11  ;;  %v742_v11 = vld.sshfl [vmem:[#allocation1 + $0x10] sm:$0xff pattern:$0x75316420]  ;;  %v369_v30 = vand.u32 15, %v1511_v26 }
 0x14d   : > { %810 = vst [vmem:[#allocation1 + $0x10] ss:$2 sm:$0xff] %v1480_v44  ;;  %747 = vrot.lane.b32.xlu2 %v742_v11, %s1331_s22  ;;  %vm384_vm13 = vcmp.ge.s32.totalorder %v1521_v33, 0 }
 0x14e   : > { %v291_v37 = vmul.f32 %v290_v36, %v1463_v2  ;;  %v1525_v34 = vadd.s32 4294967295, %v369_v30 }
 0x150   : > { %v292_v38 = vsel %vm251_vm0, %v291_v37, 0.0  ;;  %vm385_vm14 = vcmp.ge.s32.totalorder %v1525_v34, 0  ;;  %v1530_v37 = vld.sshfl [vmem:[#allocation1] sm:$0xff pattern:$0x75316420] }
 0x151   : > { %293 = vadd.xlane.f32.xlu1 %v292_v38  ;;  %v409_v38 = vsel %vm384_vm13, %v1474_v40, 0.0  ;;  %944 = vst [vmem:[#allocation1] ss:$2 sm:$0xff] %v1471_v39  ;;  %v476_v40 = vpop.permute.xlu2 %475 }
 0x152   : > { %1110 = vmatpush.msk.msra.mxu0 %vm415_vm15, %v409_v38 }
 0x154   : > { %v813_v16 = vld.sshfl [vmem:[#allocation1 + $0x10] sm:$0xff pattern:$0x75316420] }
 0x155   : > { %883 = vst [vmem:[#allocation1 + $0x10] ss:$2 sm:$0xff] %v1480_v44  ;;  %818 = vrot.lane.b32.xlu0 %v813_v16, %s1332_s24  ;;  %684 = vrot.lane.b32.xlu2 %v679_v4, %s1330_s17 }
 0x159   : > { %v478_v56 = vpop.permute.xlu2 %477 }
 0x15a   : > { %v481_v61 = vsel %vm479_vm5, %v476_v40, %v478_v56 }
 0x15b   : > { %1116 = vmatpush.msk.msra.mxu3 %vm415_vm15, %v481_v61 }
 0x15c   : > { %v886_v27 = vld.sshfl [vmem:[#allocation1 + $0x10] sm:$0xff pattern:$0x75316420] }
 0x15d   : > { %946 = vst [vmem:[#allocation1 + $0x10] ss:$2 sm:$0xff] %v1480_v44  ;;  %891 = vrot.lane.b32.xlu0 %v886_v27, %s1333_s25 }
 0x16a   : > { %473 = vrot.lane.b32.xlu1 %v470_v42, %s1327_s27  ;;  %v410_v42 = vsel %vm385_vm14, %v1476_v41, 0.0  ;;  %s1151_s27 = sshll.u32 %s1392_s3, 4  ;;  %s1018_s3 = scalar_lea.sflag [#allocation4], %s1447_s30 }
 0x16b   : > { %1112 = vmatpush.msk.msra.mxu1 %vm415_vm15, %v410_v42 }
 0x172   : > { %540 = vrot.lane.b32.xlu1 %v535_v50, %s1328_s15  ;;  %s1109_s15 = sshll.u32 %s1447_s30, 4 }
 0x17a   : > { %609 = vrot.lane.b32.xlu1 %v605_v55, %s1329_s16 }
 0x182   : > { %745 = vrot.lane.b32.xlu1 %v741_v1, %s1331_s22  ;;  %s1029_s22 = scalar_lea.hbm %s1657_s5, %s1151_s27 }
 0x18a   : > { %680 = vrot.lane.b32.xlu1 %v677_v59, %s1330_s17 }
 0x192   : > { %816 = vrot.lane.b32.xlu1 %v812_v15, %s1332_s24 }
 0x19a   : > { %889 = vrot.lane.b32.xlu1 %v885_v25, %s1333_s25 }
 0x1c4   : > { %v1485_v46 = vpop.xlane.xlu1 %293 }
 0x1c5   : > { %v295_v47 = vmul.f32 %v1485_v46, %v1485_v46 }
 0x1c7   : > { %v296_v51 = vrot.slane %v295_v47, 4 }
 0x1c9   : > { %v297_v52 = vadd.f32 %v296_v51, %v295_v47 }
 0x1cb   : > { %v298_v53 = vrot.slane %v297_v52, 2 }
 0x1cd   : > { %v299_v54 = vadd.f32 %v298_v53, %v297_v52 }
 0x1cf   : > { %v300_v57 = vrot.slane %v299_v54, 1 }
 0x1d1   : > { %v301_v58 = vadd.f32 %v300_v57, %v299_v54 }
 0x1d3   : > { %1222 = vrsqrt.f32 %v301_v58  ;;  %vm309_vm7 = vcmp.eq.f32.partialorder %v301_v58, inf  ;;  %v312_v8 = vand.u32 2147483648, %v301_v58  ;;  %vm311_vm8 = vcmp.eq.f32.partialorder %v301_v58, 0.0 }
 0x1d9   : > { %v1223_v62 = vpop.eup %1222 }
 0x1da   : > { %v303_v63 = vmul.f32 %v1223_v62, %v301_v58 }
 0x1dc   : > { %v304_v0 = vmul.f32 %v1223_v62, %v303_v63  ;;  %v474_v60 = vpop.permute.xlu1 %473 }
 0x1dd   : > { %v480_v63 = vsel %vm479_vm5, %v474_v60, %v476_v40 }
 0x1de   : > { %v305_v3 = vmul.f32 0.5, %v304_v0  ;;  %1114 = vmatpush.msk.msra.mxu2 %vm415_vm15, %v480_v63 }
 0x1e0   : > { %v306_v5 = vsub.f32 1.5, %v305_v3  ;;  %v947_v3 = vld.sshfl [vmem:[#allocation1] sm:$0xff pattern:$0x75316420] }
 0x1e2   : > { %v307_v6 = vmul.f32 %v1223_v62, %v306_v5  ;;  %v537_v62 = vpop.permute.xlu2 %536 }
 0x1e4   : > { %v308_v7 = vmul.f32 %v307_v6, %v301_v58  ;;  %v949_v6 = vld.sshfl [vmem:[#allocation1 + $0x10] sm:$0xff pattern:$0x75316420] }
 0x1e6   : > { %v310_v10 = vsel %vm309_vm7, %v301_v58, %v308_v7  ;;  %v1563_v7 = vadd.s32 1, %v369_v30 }
 0x1e7   : > { %v313_v12 = vsel %vm311_vm8, %v312_v8, %v310_v10  ;;  %v541_v8 = vpop.permute.xlu1 %540 }
 0x1e8   : > { %v314_v13 = vadd.f32 1e-12, %v313_v12  ;;  %vm395_vm8 = vcmp.lt.s32.totalorder %v1563_v7, 16  ;;  %v948_v12 = vld.sshfl [vmem:[#allocation1 + $0x8] sm:$0xff pattern:$0x75316420] }
 0x1ea   : > { %1224 = vrcp.f32 %v314_v13  ;;  %v326_v22 = vand.u32 2147483648, %v314_v13  ;;  %v324_v24 = vand.u32 2147483647, %v314_v13  ;;  %vm320_vm10 = vweird.f32 %v314_v13  ;;  %v539_v0 = vpop.permute.xlu2 %538 }
 0x1eb   : > { %v543_v1 = vsel %vm542_vm6, %v537_v62, %v539_v0  ;;  %v544_v10 = vsel %vm542_vm6, %v539_v0, %v541_v8 }
 0x1ec   : > { %v327_v31 = vor.u32 1.1754944e-38, %v326_v22  ;;  %vm325_vm12 = vcmp.eq.f32.partialorder %v324_v24, 8.507059e+37  ;;  %v548_v11 = vsel %vm395_vm8, %v544_v10, 0.0  ;;  %v683_v24 = vpop.permute.xlu0 %682 }
 0x1ed   : > { %1120 = vmatpush.msk.msrb.mxu1 %vm415_vm15, %v548_v11 }
 0x1f0   : > { %v1225_v17 = vpop.eup %1224 }
 0x1f1   : > { %v316_v18 = vmul.f32 %v1225_v17, %v314_v13  ;;  %vm321_vm9 = vweird.f32 %v1225_v17  ;;  %v610_v13 = vpop.permute.xlu1 %609 }
 0x1f2   : > { %vm322_vm11 = vmor %vm320_vm10, %vm321_vm9  ;;  %v608_v5 = vpop.permute.xlu2 %607  ;;  %vm613_vm9 = vcmask 916480   ;;  %vm686_vm10 = vcmask 908288  }
 0x1f3   : > { %v317_v20 = vsub.f32 1.0, %v316_v18  ;;  %v354_v18 = vld [vmem:[%s1656_s4] sm:$0xff] }
 0x1f5   : > { %v318_v23 = vmul.f32 %v1225_v17, %v317_v20 }
 0x1f7   : > { %v319_v28 = vadd.f32 %v1225_v17, %v318_v23 }
 0x1f9   : > { %v323_v32 = vsel %vm322_vm11, %v1225_v17, %v319_v28  ;;  %v746_v21 = vpop.permute.xlu1 %745  ;;  %vm749_vm11 = vcmask 900096  }
 0x1fa   : > { %v328_v35 = vsel %vm325_vm12, %v327_v31, %v323_v32  ;;  %v612_v9 = vpop.permute.xlu2 %611  ;;  %vm820_vm12 = vcmask 785408  }
 0x1fb   : > { %v329_v36 = vmul.f32 %v328_v35, %v1485_v46  ;;  %v615_v15 = vsel %vm613_vm9, %v610_v13, %v612_v9  ;;  %v819_v35 = vpop.permute.xlu0 %818 }
 0x1fc   : > { %v619_v17 = vsel %vm385_vm14, %v615_v15, 0.0 }
 0x1fd   : > { %v330_v43 = vmul.f32 %v329_v36, %v1485_v46  ;;  %1124 = vmatpush.msk.msrb.mxu3 %vm415_vm15, %v619_v17 }
 0x1ff   : > { %v331_v44 = vrot.slane %v330_v43, 4 }
 0x201   : > { %v332_v45 = vadd.f32 %v331_v44, %v330_v43  ;;  %v681_v23 = vpop.permute.xlu1 %680 }
 0x202   : > { %v744_v19 = vpop.permute.xlu2 %743  ;;  %v687_v25 = vsel %vm686_vm10, %v681_v23, %v683_v24 }
 0x203   : > { %v333_v47 = vrot.slane %v332_v45, 2  ;;  %v750_v27 = vsel %vm749_vm11, %v744_v19, %v746_v21  ;;  %v892_v38 = vpop.permute.xlu0 %891 }
 0x205   : > { %v334_v48 = vadd.f32 %v333_v47, %v332_v45 }
 0x207   : > { %v335_v49 = vrot.slane %v334_v48, 1 }
 0x209   : > { %v336_v50 = vadd.f32 %v335_v49, %v334_v48  ;;  %v817_v32 = vpop.permute.xlu1 %816 }
 0x20a   : > { %v748_v20 = vpop.permute.xlu2 %747  ;;  %v822_v44 = vsel %vm820_vm12, %v817_v32, %v819_v35 }
 0x20b   : > { %1226 = vrcp.f32 %v336_v50  ;;  %v348_v41 = vand.u32 2147483648, %v336_v50  ;;  %v346_v46 = vand.u32 2147483647, %v336_v50  ;;  %vm342_vm1 = vweird.f32 %v336_v50 }
 0x20c   : > { %v751_v28 = vsel %vm749_vm11, %v746_v21, %v748_v20  ;;  %v826_v49 = vsel %vm385_vm14, %v822_v44, 0.0 }
 0x20d   : > { %v349_v55 = vor.u32 1.1754944e-38, %v348_v41  ;;  %vm347_vm3 = vcmp.eq.f32.partialorder %v346_v46, 8.507059e+37  ;;  %v755_v31 = vsel %vm395_vm8, %v751_v28, 0.0 }
 0x211   : > { %v1227_v51 = vpop.eup %1226 }
 0x212   : > { %v338_v52 = vmul.f32 %v1227_v51, %v336_v50  ;;  %vm343_vm0 = vweird.f32 %v1227_v51  ;;  %v685_v22 = vpop.permute.xlu2 %684 }
 0x213   : > { %vm344_vm2 = vmor %vm342_vm1, %vm343_vm0  ;;  %v688_v26 = vsel %vm686_vm10, %v683_v24, %v685_v22  ;;  %vm893_vm0 = vcmask 777216  }
 0x214   : > { %v339_v53 = vsub.f32 1.0, %v338_v52 }
 0x216   : > { %v340_v54 = vmul.f32 %v1227_v51, %v339_v53 }
 0x218   : > { %v341_v39 = vadd.f32 %v1227_v51, %v340_v54 }
 0x21a   : > { %v345_v57 = vsel %vm344_vm2, %v1227_v51, %v341_v39 }
 0x21b   : > { %v350_v58 = vsel %vm347_vm3, %v349_v55, %v345_v57 }
 0x21c   : > { %v351_v59 = vmul.f32 %v350_v58, %v1463_v2  ;;  %v1552_v2 = vadd.s32 1, %v362_v29 }
 0x21e   : > { %620 = vrot.lane.b32.xlu0 %v351_v59, %s1334_s6  ;;  %549 = vrot.lane.b32.xlu1 %v351_v59, %s1335_s8  ;;  %vm394_vm7 = vcmp.lt.s32.totalorder %v1552_v2, 16  ;;  %s1033_s6 = sshll.u32 %s1029_s22, 4  ;;  %s1034_s6 = int_to_ptr.hbm [resolvable:$true] %s1033_s6 }
 0x21f   : > { %464 = vrot.lane.b32.xlu2 %v351_v59, %s1336_s7  ;;  %1111 = vmatmul.msk.f32.vlgmr.msra.gmra.mxu0 %vm411_vm4, %v351_v59  ;;  %v547_v4 = vsel %vm394_vm7, %v543_v1, 0.0  ;;  %v754_v30 = vsel %vm394_vm7, %v750_v27, 0.0  ;;  %s1272_s8 = sshra.s32 %s1034_s6, 4  ;;  %s1273_s8 = int_to_ptr.hbm [resolvable:$true] %s1272_s8 }
 0x220   : > { %1113 = vmatmul.msk.f32.vlgmr.msra.gmra.mxu1 %vm411_vm4, %v351_v59  ;;  %1118 = vmatpush.msk.msrb.mxu0 %vm415_vm15, %v547_v4  ;;  %s1274_s7 = scalar_lea.hbm %s1273_s8, 16  ;;  %p1279_p3 = scmp.lt.s32.totalorder %s1273_s8, %s1657_s5 }
 0x221   : > { %1128 = vmatpush.msk.msra.mxu1 %vm415_vm15, %v688_v26  ;;  %p1275_p6 = scmp.ne.s32.totalorder %s1273_s8, %s1274_s7 }
 0x222   : > { %1126 = vmatpush.msk.msra.mxu0 %vm415_vm15, %v687_v25 }
 0x223   : > { %p1276_p13 = pnand %p1275_p6, %p1417_p11 }
 0x225   : > { %p1277_p2 = pneg %p1276_p13 }
 0x226   : > { %756 = vrot.lane.b32.xlu0 %v351_v59, %s1337_s9  ;;  %672 = vrot.lane.b32.xlu1 %v351_v59, %s1329_s16 }
 0x227   : > { %814 = vrot.lane.b32.xlu2 %v1502_v14, %s1332_s24  ;;  %v614_v14 = vsel %vm613_vm9, %v608_v5, %v610_v13 }
 0x228   : > { %v618_v16 = vsel %vm384_vm13, %v614_v14, 0.0 }
 0x229   : > { %1122 = vmatpush.msk.msrb.mxu2 %vm415_vm15, %v618_v16 }
 0x22e   : > { %950 = vrot.lane.b32.xlu0 %v947_v3, %s1338_s10  ;;  %879 = vrot.lane.b32.xlu1 %v351_v59, %s1339_s11  ;;  %s1278_s11 = scalar_lea.hbm %s1657_s5, 32 }
 0x22f   : > { %887 = vrot.lane.b32.xlu2 %v1530_v37, %s1333_s25  ;;  %v890_v37 = vpop.permute.xlu1 %889  ;;  %p1280_p4 = scmp.lt.s32.totalorder %s1278_s11, %s1274_s7 }
 0x230   : > { %v895_v40 = vsel %vm893_vm0, %v890_v37, %v892_v38 }
 0x231   : > { %p1281_p5 = por %p1280_p4, %p1279_p3 }
 0x233   : > { %p1282_p7 = pnand %p1281_p5, %p1277_p2 }
 0x236   : > { %963 = vrot.lane.b32.xlu0 %v351_v59, %s1332_s24  ;;  %954 = vrot.lane.b32.xlu1 %v949_v6, %s1338_s10  ;;  %s242_s24 = scalar_lea.vmem [#allocation5], %s1109_s15 }
 0x237   : > { %827 = vrot.lane.b32.xlu2 %v351_v59, %s1340_s12  ;;  %s1031_s25 = sshll.u32 %s242_s24, 4  ;;  %s1032_s25 = int_to_ptr.vmem [resolvable:$true] %s1031_s25 }
 0x23f   : > { %952 = vrot.lane.b32.xlu2 %v948_v12, %s1338_s10 }
 0x247   : > { %400 = vperm.xlu2 %1217, %v354_v18  }
 0x279   : > { %v465_v29 = vpop.permute.xlu2 %464 }
 0x27a   : > { %1115 = vmatmul.msk.f32.vlgmr.msra.gmra.mxu2 %vm411_vm4, %v465_v29  ;;  %1117 = vmatmul.msk.f32.vlgmr.msra.gmra.mxu3 %vm411_vm4, %v465_v29 }
 0x27b   : > { %1130 = vmatpush.msk.msra.mxu2 %vm415_vm15, %v754_v30  ;;  %1132 = vmatpush.msk.msra.mxu3 %vm415_vm15, %v755_v31 }
 0x281   : > { %v815_v36 = vpop.permute.xlu2 %814 }
 0x282   : > { %v821_v43 = vsel %vm820_vm12, %v815_v36, %v817_v32 }
 0x283   : > { %v825_v48 = vsel %vm384_vm13, %v821_v43, 0.0  ;;  %vm956_vm13 = vcmask 769024  }
 0x289   : > { %v888_v42 = vpop.permute.xlu2 %887 }
 0x28a   : > { %v894_v50 = vsel %vm893_vm0, %v888_v42, %v890_v37 }
 0x290   : > { %v550_v45 = vpop.permute.xlu1 %549  ;;  %v621_v47 = vpop.permute.xlu0 %620 }
 0x291   : > { %1119 = vmatmul.msk.f32.vlgmr.msrb.gmra.mxu0 %vm411_vm4, %v550_v45  ;;  %1121 = vmatmul.msk.f32.vlgmr.msrb.gmra.mxu1 %vm411_vm4, %v550_v45  ;;  %v828_v51 = vpop.permute.xlu2 %827 }
 0x292   : > { %1123 = vmatmul.msk.f32.vlgmr.msrb.gmra.mxu2 %vm411_vm4, %v621_v47  ;;  %1125 = vmatmul.msk.f32.vlgmr.msrb.gmra.mxu3 %vm411_vm4, %v621_v47 }
 0x293   : > { %1134 = vmatpush.msk.msrb.mxu0 %vm415_vm15, %v825_v48  ;;  %1136 = vmatpush.msk.msrb.mxu1 %vm415_vm15, %v826_v49 }
 0x294   : > { %1138 = vmatpush.msk.msrb.mxu2 %vm415_vm15, %v894_v50  ;;  %1140 = vmatpush.msk.msrb.mxu3 %vm415_vm15, %v895_v40 }
 0x298   : > { %v673_v33 = vpop.permute.xlu1 %672  ;;  %v757_v52 = vpop.permute.xlu0 %756 }
 0x299   : > { %1127 = vmatmul.msk.f32.vlgmr.msra.gmra.mxu0 %vm411_vm4, %v673_v33  ;;  %1129 = vmatmul.msk.f32.vlgmr.msra.gmra.mxu1 %vm411_vm4, %v673_v33  ;;  %v953_v34 = vpop.permute.xlu2 %952 }
 0x29a   : > { %1131 = vmatmul.msk.f32.vlgmr.msra.gmra.mxu2 %vm411_vm4, %v757_v52  ;;  %1133 = vmatmul.msk.f32.vlgmr.msra.gmra.mxu3 %vm411_vm4, %v757_v52 }
 0x29c   : > { %v439_v58 = vpop.f32.mrf.mxu0 }
 0x29d   : > { %v459_v59 = vpop.f32.mrf.mxu1 }
 0x2a0   : > { %v880_v53 = vpop.permute.xlu1 %879  ;;  %v951_v41 = vpop.permute.xlu0 %950 }
 0x2a1   : > { %v957_v54 = vsel %vm956_vm13, %v951_v41, %v953_v34  ;;  %1135 = vmatmul.msk.f32.vlgmr.msrb.gmra.mxu0 %vm411_vm4, %v828_v51  ;;  %1137 = vmatmul.msk.f32.vlgmr.msrb.gmra.mxu1 %vm411_vm4, %v828_v51  ;;  %v401_v2 = vpop.permute.xlu2 %400 }
 0x2a2   : > { %v961_v46 = vsel %vm394_vm7, %v957_v54, 0.0  ;;  %1139 = vmatmul.msk.f32.vlgmr.msrb.gmra.mxu2 %vm411_vm4, %v880_v53  ;;  %1141 = vmatmul.msk.f32.vlgmr.msrb.gmra.mxu3 %vm411_vm4, %v880_v53  ;;  %v462_v0 = vadd.f32 %v439_v58, %v401_v2  ;;  %v463_v4 = vadd.f32 %v459_v59, %v401_v2 }
 0x2a3   : > { %1142 = vmatpush.msk.msra.mxu0 %vm415_vm15, %v961_v46 }
 0x2a8   : > { %v955_v39 = vpop.permute.xlu1 %954  ;;  %v964_v55 = vpop.permute.xlu0 %963 }
 0x2a9   : > { %v958_v56 = vsel %vm956_vm13, %v953_v34, %v955_v39  ;;  %1143 = vmatmul.msk.f32.vlgmr.msra.gmra.mxu0 %vm411_vm4, %v964_v55 }
 0x2aa   : > { %v962_v57 = vsel %vm395_vm8, %v958_v56, 0.0 }
 0x2ab   : > { %1144 = vmatpush.msk.msra.mxu1 %vm415_vm15, %v962_v57 }
 0x2ac   : > { %1145 = vmatmul.msk.f32.vlgmr.msra.gmra.mxu1 %vm411_vm4, %v964_v55 }
 0x2fd   : > { %v505_v60 = vpop.f32.mrf.mxu2  ;;  %v525_v61 = vpop.f32.mrf.mxu3 }
 0x2fe   : > { %v528_v5 = vadd.f32 %v505_v60, %v462_v0  ;;  %v529_v8 = vadd.f32 %v525_v61, %v463_v4 }
 0x30e   : > { %v576_v62 = vpop.f32.mrf.mxu0  ;;  %v596_v63 = vpop.f32.mrf.mxu1 }
 0x30f   : > { %v599_v9 = vadd.f32 %v576_v62, %v528_v5  ;;  %v600_v10 = vadd.f32 %v596_v63, %v529_v8 }
 0x315   : > { %v647_v1 = vpop.f32.mrf.mxu2  ;;  %v667_v3 = vpop.f32.mrf.mxu3 }
 0x316   : > { %v712_v6 = vpop.f32.mrf.mxu0  ;;  %v732_v7 = vpop.f32.mrf.mxu1  ;;  %v670_v11 = vadd.f32 %v647_v1, %v599_v9  ;;  %v671_v12 = vadd.f32 %v667_v3, %v600_v10 }
 0x318   : > { %v735_v15 = vadd.f32 %v712_v6, %v670_v11  ;;  %v736_v17 = vadd.f32 %v732_v7, %v671_v12 }
 0x31d   : > { %v783_v13 = vpop.f32.mrf.mxu2  ;;  %v803_v14 = vpop.f32.mrf.mxu3 }
 0x31e   : > { %v854_v16 = vpop.f32.mrf.mxu0  ;;  %v806_v18 = vadd.f32 %v783_v13, %v735_v15  ;;  %v874_v19 = vpop.f32.mrf.mxu1  ;;  %v807_v20 = vadd.f32 %v803_v14, %v736_v17 }
 0x320   : > { %v877_v21 = vadd.f32 %v854_v16, %v806_v18  ;;  %v878_v24 = vadd.f32 %v874_v19, %v807_v20 }
 0x325   : > { %v919_v22 = vpop.f32.mrf.mxu2  ;;  %v939_v23 = vpop.f32.mrf.mxu3 }
 0x326   : > { %v942_v25 = vadd.f32 %v919_v22, %v877_v21  ;;  %v990_v26 = vpop.f32.mrf.mxu0  ;;  %v943_v27 = vadd.f32 %v939_v23, %v878_v24 }
 0x328   : > { %v1013_v28 = vadd.f32 %v990_v26, %v942_v25 }
 0x329   : > { %v1010_v29 = vpop.f32.mrf.mxu1 }
 0x32a   : > { %1015 = vst [vmem:[%s242_s24] sm:$0xff] %v1013_v28  ;;  %v1014_v30 = vadd.f32 %v1010_v29, %v943_v27 }
 0x32c   : > { %1016 = vst [vmem:[%s242_s24 + $0x8] sm:$0xff] %v1014_v30 }
 0x32d   : > { %1285 = shalt.err (!%p1282_p7)
}
 0x32e   : > { %1157 = dma.vmem_to_hbm [thread:$0]  (%p1417_p11), %s1032_s25, 256, %s1034_s6, %s1018_s3  }
 0x32f PF: > { %s1045_s30 = sand.u32 1, %s1312_s18   ;;  %p1164_p8 = pnand %p1106_p9, %p1421_p12 }
 0x330   : > { %s1046_s14 = scalar_lea.sflag [#allocation4], %s1045_s30 }
 0x331   : > { %p1165_p10 = pneg %p1164_p8 }
 0x333   : > { %1307 = dma.done.wait (%p1165_p10), %s1046_s14, 256  }
 0x334   : > { %1309 = vsyncadd (%p1165_p10), %s1046_s14, 4294967040  ;;  %p18_p0 = scmp.ge.s32.totalorder %s1396_s23, 4   ;;  %s1662_s18 = smov %s1316_s19 }
 0x335   : > { %s1663_s19 = smov %s1320_s20  ;;  %s1664_s20 = smov %s1408_s26 }
 0x336   : > { %s1665_s21 = smov %s1396_s23  ;;  %20 = sbr.rel (!%p18_p0) target bundleno = 5 (0x5), region = 93 }
 0x33b   :  { %1052 = vsyncpa [#allocation3], 1 }
 0x33c   :  { %1054 = vsyncpa [#allocation3 + $0x1], 1 }
 0x33d   :  { %1055 = vsyncpa [#allocation4], 1 }
 0x33e   :  { %1057 = vsyncpa [#allocation4 + $0x1], 1 }

</bundles_post_ra>
